<compile_context>
chip_gen: v5e
topology: v5e:2x2
jax: 0.10.0
libtpu: 0.0.40
codegen_flags: <defaults>
</compile_context>

<pallas_src>
import functools

import jax
import jax.numpy as jnp
from jax import lax
from jax.experimental import pallas as pl
from jax.experimental.pallas import tpu as pltpu


def _round_up(x: int, m: int) -> int:
    return ((x + m - 1) // m) * m


def _vmem_capacity_bytes() -> int:
    """Physical VMEM of the current chip; conservative fallback (v7x)."""
    try:
        info = pltpu.get_tpu_info()
        cap = getattr(info, "vmem_capacity_bytes", None)
        if cap:
            return int(cap)
    except Exception:
        pass
    return 64 * 1024 * 1024


def _stats_kernel(x_ref, sum_ref, sq_ref):
    """Per-chunk partial sums / sums-of-squares, accumulated in (8, L).

    Grid = (chunks [parallel], steps [arbitrary / reduction]).  The hot loop is
    pure VPU adds of whole vregs; no cross-sublane XLU reduce per step.
    """
    @pl.when(pl.program_id(1) == 0)
    def _():
        sum_ref[...] = jnp.zeros_like(sum_ref)
        sq_ref[...] = jnp.zeros_like(sq_ref)

    tm, L = x_ref.shape
    xb = x_ref[...].astype(jnp.float32)          # (tm, L)
    xg = xb.reshape(tm // 8, 8, L)               # vreg-aligned (sublane) groups
    sum_ref[...] += jnp.sum(xg, axis=0)          # (8, L): elementwise vreg adds
    sq_ref[...] += jnp.sum(xg * xg, axis=0)


def _normalize_kernel(x_ref, scale_ref, bias_ref, o_ref):
    """y = x * scale + bias  (scale/bias already fold mean/rstd/gamma/beta)."""
    xb = x_ref[...].astype(jnp.float32)
    o_ref[...] = (xb * scale_ref[...] + bias_ref[...]).astype(o_ref.dtype)


@functools.partial(jax.jit, static_argnames=("eps",))
def batchnorm2d_forward(x, gamma, beta, eps=1e-5):
    """x: (batch, time, channel1, channel2); gamma/beta: (channel2,)."""
    B, T, C1, C2 = x.shape
    M = B * T * C1                               # elements per channel

    # ---- Lane folding: present a 128-lane-dense slab when C2 < 128 ----------
    fold = 1
    if C2 < 128 and 128 % C2 == 0 and M % (128 // C2) == 0:
        fold = 128 // C2
    L = C2 * fold
    Mf = M // fold
    x2d = x.reshape(Mf, L)                       # contiguous reshape (no copy)

    # ---- VMEM-budgeted row tile + explicit vmem limit ------------------------
    cap = _vmem_capacity_bytes()
    tile_bytes = min(8 * 1024 * 1024, cap // 8)  # ~8 MiB blocks (v7x-safe)
    itemsize = jnp.dtype(x.dtype).itemsize
    tm = max(8, (tile_bytes // (L * itemsize)) // 8 * 8)
    tm = min(tm, _round_up(Mf, 8))
    # Enough for double-buffered input+output tiles in pass 2, with headroom.
    vmem_limit = int(max(int(cap * 0.7), 5 * tm * L * itemsize))

    # ---- Split the stats reduction across chunks (both TCs on v7x) ----------
    NC = 2 if Mf >= 2 * tm else 1
    Mp = _round_up(Mf, tm * NC)
    if Mp != Mf:
        # Zero rows add 0 to sum/sumsq; true count M is used for the mean.
        x2d = jnp.pad(x2d, ((0, Mp - Mf), (0, 0)))
    steps = Mp // (tm * NC)

    # ---- Pass 1: partial per-lane sums and sums of squares -------------------
    sums8, sqs8 = pl.pallas_call(
        _stats_kernel,
        out_shape=(
            jax.ShapeDtypeStruct((NC * 8, L), jnp.float32),
            jax.ShapeDtypeStruct((NC * 8, L), jnp.float32),
        ),
        grid_spec=pltpu.PrefetchScalarGridSpec(
            num_scalar_prefetch=0,
            grid=(NC, steps),
            in_specs=[pl.BlockSpec((tm, L), lambda c, i: (c * steps + i, 0))],
            out_specs=(
                pl.BlockSpec((8, L), lambda c, i: (c, 0)),
                pl.BlockSpec((8, L), lambda c, i: (c, 0)),
            ),
        ),
        compiler_params=pltpu.CompilerParams(
            dimension_semantics=("parallel", "arbitrary"),
            vmem_limit_bytes=vmem_limit),
    )(x2d)

    # ---- Tiny glue: fold partials -> per-channel scale / bias ----------------
    count = jnp.float32(M)
    ch_sum = sums8.reshape(-1, C2).sum(axis=0)               # (C2,)
    ch_sq = sqs8.reshape(-1, C2).sum(axis=0)                 # (C2,)
    mean = ch_sum / count
    var = jnp.maximum(ch_sq / count - mean * mean, 0.0)      # biased, clamped
    rstd = lax.rsqrt(var + jnp.float32(eps))
    scale = gamma.astype(jnp.float32) * rstd                 # gamma / std
    bias = beta.astype(jnp.float32) - mean * scale           # beta - mean*scale
    scale_l = jnp.tile(scale, fold).reshape(1, L)
    bias_l = jnp.tile(bias, fold).reshape(1, L)

    # ---- Pass 2: elementwise FMA  y = x*scale + bias -------------------------
    y2d = pl.pallas_call(
        _normalize_kernel,
        out_shape=jax.ShapeDtypeStruct((Mp, L), x.dtype),
        grid_spec=pltpu.PrefetchScalarGridSpec(
            num_scalar_prefetch=0,
            grid=(Mp // tm,),
            in_specs=[
                pl.BlockSpec((tm, L), lambda i: (i, 0)),
                pl.BlockSpec((1, L), lambda i: (0, 0)),
                pl.BlockSpec((1, L), lambda i: (0, 0)),
            ],
            out_specs=pl.BlockSpec((tm, L), lambda i: (i, 0)),
        ),
        compiler_params=pltpu.CompilerParams(
            dimension_semantics=("parallel",),
            vmem_limit_bytes=vmem_limit),
    )(x2d, scale_l, bias_l)

    return y2d[:Mf].reshape(B, T, C1, C2)


if __name__ == "__main__":
    key = jax.random.PRNGKey(0)
    kx, kg, kb = jax.random.split(key, 3)

    # (batch, time, channel1, channel2) — BatchNorm runs over channel2.
    B, T, C1, C2 = 2, 8, 4, 32
    x = jax.random.normal(kx, (B, T, C1, C2), dtype=jnp.float32)

    gamma = 1.0 + 0.1 * jax.random.normal(kg, (C2,), dtype=jnp.float32)
    beta = 0.1 * jax.random.normal(kb, (C2,), dtype=jnp.float32)

    eps = 1e-5
    out = jax.block_until_ready(batchnorm2d_forward(x, gamma, beta, eps=eps))

    # Pure-JAX reference (training-mode batch stats, biased variance).
    mean_ref = jnp.mean(x, axis=(0, 1, 2), keepdims=True)
    var_ref = jnp.mean((x - mean_ref) ** 2, axis=(0, 1, 2), keepdims=True)
    ref = (x - mean_ref) / jnp.sqrt(var_ref + eps) * gamma + beta

    assert out.shape == x.shape and out.dtype == x.dtype
    assert jnp.allclose(out, ref, atol=1e-4, rtol=1e-4), "mismatch vs reference"

    print("KERNEL_OK")
</pallas_src>

<mosaic_0001>
module attributes {stable_mosaic.version = 11 : i64} {
  func.func @_stats_kernel(%arg0: i32, %arg1: i32, %arg2: memref<16x128xf32, #tpu.memory_space<vmem>>, %arg3: memref<8x128xf32, #tpu.memory_space<vmem>>, %arg4: memref<8x128xf32, #tpu.memory_space<vmem>>) attributes {dimension_semantics = [#tpu.dimension_semantics<parallel>, #tpu.dimension_semantics<arbitrary>], iteration_bounds = array<i64: 1, 1>, scalar_prefetch = 0 : i64, scratch_operands = 0 : i64, tpu.core_type = #tpu.core_type<tc>, window_params = [{transform_indices = @transform_0, window_bounds = array<i64: 16, 128>}, {transform_indices = @transform_1, window_bounds = array<i64: 8, 128>}, {transform_indices = @transform_2, window_bounds = array<i64: 8, 128>}]} {
    %c0_i32 = arith.constant 0 : i32
    %0 = arith.cmpi eq, %arg1, %c0_i32 : i32
    %1 = arith.extui %0 : i1 to i32
    %c0_i32_0 = arith.constant 0 : i32
    %2 = arith.cmpi ne, %1, %c0_i32_0 : i32
    scf.if %2 {
      %cst_11 = arith.constant 0.000000e+00 : f32
      %14 = vector.broadcast %cst_11 : f32 to vector<8x128xf32>
      %c0_12 = arith.constant 0 : index
      %c0_13 = arith.constant 0 : index
      %15 = vector.load %arg3[%c0_12, %c0_13] : memref<8x128xf32, #tpu.memory_space<vmem>>, vector<8x128xf32>
      tpu.vector_store %arg3[%c0_12, %c0_13], %14 {strides = array<i32>} : memref<8x128xf32, #tpu.memory_space<vmem>>, vector<8x128xf32>,
      %cst_14 = arith.constant 0.000000e+00 : f32
      %16 = vector.broadcast %cst_14 : f32 to vector<8x128xf32>
      %c0_15 = arith.constant 0 : index
      %c0_16 = arith.constant 0 : index
      %17 = vector.load %arg4[%c0_15, %c0_16] : memref<8x128xf32, #tpu.memory_space<vmem>>, vector<8x128xf32>
      tpu.vector_store %arg4[%c0_15, %c0_16], %16 {strides = array<i32>} : memref<8x128xf32, #tpu.memory_space<vmem>>, vector<8x128xf32>,
    } else {
    }
    %c0 = arith.constant 0 : index
    %c0_1 = arith.constant 0 : index
    %3 = vector.load %arg2[%c0, %c0_1] : memref<16x128xf32, #tpu.memory_space<vmem>>, vector<16x128xf32>
    %4 = vector.shape_cast %3 : vector<16x128xf32> to vector<2x8x128xf32>
    %c0_2 = arith.constant 0 : index
    %c0_3 = arith.constant 0 : index
    %5 = vector.load %arg3[%c0_2, %c0_3] : memref<8x128xf32, #tpu.memory_space<vmem>>, vector<8x128xf32>
    %cst = arith.constant dense<0.000000e+00> : vector<8x128xf32>
    %6 = vector.multi_reduction <add>, %4, %cst [0] : vector<2x8x128xf32> to vector<8x128xf32>
    %7 = arith.addf %5, %6 : vector<8x128xf32>
    %c0_4 = arith.constant 0 : index
    %c0_5 = arith.constant 0 : index
    %8 = vector.load %arg3[%c0_4, %c0_5] : memref<8x128xf32, #tpu.memory_space<vmem>>, vector<8x128xf32>
    tpu.vector_store %arg3[%c0_4, %c0_5], %7 {strides = array<i32>} : memref<8x128xf32, #tpu.memory_space<vmem>>, vector<8x128xf32>,
    %c0_6 = arith.constant 0 : index
    %c0_7 = arith.constant 0 : index
    %9 = vector.load %arg4[%c0_6, %c0_7] : memref<8x128xf32, #tpu.memory_space<vmem>>, vector<8x128xf32>
    %10 = arith.mulf %4, %4 : vector<2x8x128xf32>
    %cst_8 = arith.constant dense<0.000000e+00> : vector<8x128xf32>
    %11 = vector.multi_reduction <add>, %10, %cst_8 [0] : vector<2x8x128xf32> to vector<8x128xf32>
    %12 = arith.addf %9, %11 : vector<8x128xf32>
    %c0_9 = arith.constant 0 : index
    %c0_10 = arith.constant 0 : index
    %13 = vector.load %arg4[%c0_9, %c0_10] : memref<8x128xf32, #tpu.memory_space<vmem>>, vector<8x128xf32>
    tpu.vector_store %arg4[%c0_9, %c0_10], %12 {strides = array<i32>} : memref<8x128xf32, #tpu.memory_space<vmem>>, vector<8x128xf32>,
    return
  }
  func.func @transform_0(%arg0: i32, %arg1: i32) -> (i32, i32) {
    %c1_i32 = arith.constant 1 : i32
    %0 = arith.muli %arg0, %c1_i32 : i32
    %1 = arith.addi %0, %arg1 : i32
    %c0_i32 = arith.constant 0 : i32
    %c0_i32_0 = arith.constant 0 : i32
    return %1, %c0_i32 : i32, i32
  }
  func.func @transform_1(%arg0: i32, %arg1: i32) -> (i32, i32) {
    %c0_i32 = arith.constant 0 : i32
    %c0_i32_0 = arith.constant 0 : i32
    return %arg0, %c0_i32 : i32, i32
  }
  func.func @transform_2(%arg0: i32, %arg1: i32) -> (i32, i32) {
    %c0_i32 = arith.constant 0 : i32
    %c0_i32_0 = arith.constant 0 : i32
    return %arg0, %c0_i32 : i32, i32
  }
}

module attributes {stable_mosaic.version = 11 : i64} {
  func.func @_normalize_kernel(%arg0: i32, %arg1: memref<16x128xf32, #tpu.memory_space<vmem>>, %arg2: memref<1x128xf32, #tpu.memory_space<vmem>>, %arg3: memref<1x128xf32, #tpu.memory_space<vmem>>, %arg4: memref<16x128xf32, #tpu.memory_space<vmem>>) attributes {dimension_semantics = [#tpu.dimension_semantics<parallel>], iteration_bounds = array<i64: 1>, scalar_prefetch = 0 : i64, scratch_operands = 0 : i64, tpu.core_type = #tpu.core_type<tc>, window_params = [{transform_indices = @transform_0, window_bounds = array<i64: 16, 128>}, {pipeline_mode = #tpu.pipeline_mode<synchronous>, transform_indices = @transform_1, window_bounds = array<i64: 1, 128>}, {pipeline_mode = #tpu.pipeline_mode<synchronous>, transform_indices = @transform_2, window_bounds = array<i64: 1, 128>}, {transform_indices = @transform_3, window_bounds = array<i64: 16, 128>}]} {
    %c0 = arith.constant 0 : index
    %c0_0 = arith.constant 0 : index
    %0 = vector.load %arg1[%c0, %c0_0] : memref<16x128xf32, #tpu.memory_space<vmem>>, vector<16x128xf32>
    %c0_1 = arith.constant 0 : index
    %c0_2 = arith.constant 0 : index
    %1 = vector.load %arg2[%c0_1, %c0_2] : memref<1x128xf32, #tpu.memory_space<vmem>>, vector<1x128xf32>
    %2 = vector.broadcast %1 : vector<1x128xf32> to vector<16x128xf32>
    %3 = arith.mulf %0, %2 : vector<16x128xf32>
    %c0_3 = arith.constant 0 : index
    %c0_4 = arith.constant 0 : index
    %4 = vector.load %arg3[%c0_3, %c0_4] : memref<1x128xf32, #tpu.memory_space<vmem>>, vector<1x128xf32>
    %5 = vector.broadcast %4 : vector<1x128xf32> to vector<16x128xf32>
    %6 = arith.addf %3, %5 : vector<16x128xf32>
    %c0_5 = arith.constant 0 : index
    %c0_6 = arith.constant 0 : index
    %7 = vector.load %arg4[%c0_5, %c0_6] : memref<16x128xf32, #tpu.memory_space<vmem>>, vector<16x128xf32>
    tpu.vector_store %arg4[%c0_5, %c0_6], %6 {strides = array<i32>} : memref<16x128xf32, #tpu.memory_space<vmem>>, vector<16x128xf32>,
    return
  }
  func.func @transform_0(%arg0: i32) -> (i32, i32) {
    %c0_i32 = arith.constant 0 : i32
    %c0_i32_0 = arith.constant 0 : i32
    return %arg0, %c0_i32 : i32, i32
  }
  func.func @transform_1(%arg0: i32) -> (i32, i32) {
    %c0_i32 = arith.constant 0 : i32
    %c0_i32_0 = arith.constant 0 : i32
    %c0_i32_1 = arith.constant 0 : i32
    return %c0_i32, %c0_i32_0 : i32, i32
  }
  func.func @transform_2(%arg0: i32) -> (i32, i32) {
    %c0_i32 = arith.constant 0 : i32
    %c0_i32_0 = arith.constant 0 : i32
    %c0_i32_1 = arith.constant 0 : i32
    return %c0_i32, %c0_i32_0 : i32, i32
  }
  func.func @transform_3(%arg0: i32) -> (i32, i32) {
    %c0_i32 = arith.constant 0 : i32
    %c0_i32_0 = arith.constant 0 : i32
    return %arg0, %c0_i32 : i32, i32
  }
}

</mosaic_0001>

<bundles_post_ra>
// kernel: tile.18
= control target key start
LH: loop header
LB: loop body
LE: loop exit
PB: predicated region body
PF: predicated region fallthrough
CT: control target
= control target key end

     0   :  { %s22_s0 = inlined_call_operand.vmem [shape: f32[32], index: 0, kind: input, shape index: {}]   ;;  %s23_s1 = inlined_call_operand.vmem [shape: f32[4,32], index: 1, kind: output, shape index: {}]  }
   0x1   :  { %v4_v0 = vld [vmem:[%s22_s0] ss:$0 sm:$0xff] }
   0x2   :  { %5 = vst [vmem:[%s23_s1] sm:$0xf] %v4_v0 }

// kernel: tile.19
= control target key start
LH: loop header
LB: loop body
LE: loop exit
PB: predicated region body
PF: predicated region fallthrough
CT: control target
= control target key end

     0   :  { %s37_s8 = smov 32   ;;  %s38_s9 = smov 64   ;;  %vm7_vm0 = vcmask 261120   ;;  %vm13_vm1 = vcmask 1048320   ;;  %vm19_vm2 = vcmask 785920   ;;  %vm25_vm3 = vcmask 523520   ;;  %s55_s0 = inlined_call_operand.vmem [shape: f32[4,32], index: 0, kind: input, shape index: {}]   ;;  %s56_s1 = inlined_call_operand.vmem [shape: f32[1,128], index: 1, kind: output, shape index: {}]  }
   0x1   :  { %v4_v0 = vld [vmem:[%s55_s0] sm:$0xf]  ;;  %s36_s0 = smov 96  }
   0x2   :  { %5 = vst [vmem:[#allocation1] sm:$0xf] %v4_v0 }
   0x9   :  { %v10_v1 = vld [vmem:[#allocation1 + $0x3] sm:$0x1]   ;;  %v22_v2 = vld [vmem:[#allocation1 + $0x1] sm:$0x1]   ;;  %v16_v3 = vld [vmem:[#allocation1 + $0x2] sm:$0x1]  }
   0xa   :  { %11 = vrot.lane.b32.xlu0 %v10_v1, %s36_s0  ;;  %23 = vrot.lane.b32.xlu1 %v22_v2, %s37_s8  ;;  %v6_v4 = vld [vmem:[#allocation1] sm:$0x1]  }
   0xb   :  { %8 = vst.msk [vmem:[#allocation0] sm:$0x1] %vm7_vm0, %v6_v4  }
  0x12   :  { %17 = vrot.lane.b32.xlu0 %v16_v3, %s38_s9 }
  0x7c   :  { %v12_v5 = vpop.permute.xlu0 %11   ;;  %v24_v6 = vpop.permute.xlu1 %23  }
  0x7d   :  { %14 = vst.msk [vmem:[#allocation0] sm:$0x1] %vm13_vm1, %v12_v5  }
  0x84   :  { %v18_v7 = vpop.permute.xlu0 %17  }
  0x85   :  { %20 = vst.msk [vmem:[#allocation0] sm:$0x1] %vm19_vm2, %v18_v7  }
  0x86   :  { %26 = vst.msk [vmem:[#allocation0] sm:$0x1] %vm25_vm3, %v24_v6  }
  0x8d   :  { %v29_v8 = vld [vmem:[#allocation0] sm:$0x1] }
  0x8e   :  { %32 = vst [vmem:[%s56_s1] sm:$0x1] %v29_v8 }

// kernel: batchnorm2d_forward.2
= control target key start
LH: loop header
LB: loop body
LE: loop exit
PB: predicated region body
PF: predicated region fallthrough
CT: control target
= control target key end

     0   :  { %s92_s0 = inlined_call_operand.vmem [shape: f32[16,128], index: 0, kind: input, shape index: {}]   ;;  %s93_s1 = inlined_call_operand.vmem [shape: f32[8,128], index: 1, kind: output, shape index: {0}]   ;;  %s94_s2 = inlined_call_operand.vmem [shape: f32[8,128], index: 2, kind: output, shape index: {1}]  }
   0x1   :  { %v38_v0 = vld [vmem:[%s92_s0] sm:$0xff]  ;;  %v39_v1 = vld [vmem:[%s92_s0 + $0x8] sm:$0xff] }
   0x2   :  { %v41_v2 = vadd.f32 %v39_v1, %v38_v0  ;;  %v45_v3 = vmul.f32 %v38_v0, %v38_v0  ;;  %v46_v4 = vmul.f32 %v39_v1, %v39_v1 }
   0x4   :  { %v47_v5 = vadd.f32 %v46_v4, %v45_v3  ;;  %43 = vst [vmem:[%s93_s1] sm:$0xff] %v41_v2 }
   0x6   :  { %49 = vst [vmem:[%s94_s2] sm:$0xff] %v47_v5 }

// kernel: batchnorm2d_forward.3
= control target key start
LH: loop header
LB: loop body
LE: loop exit
PB: predicated region body
PF: predicated region fallthrough
CT: control target
= control target key end

     0   :  { %s74_s0 = inlined_call_operand.vmem [shape: f32[16,128], index: 0, kind: input, shape index: {}]   ;;  %s75_s1 = inlined_call_operand.vmem [shape: f32[1,128], index: 1, kind: input, shape index: {}]   ;;  %s76_s2 = inlined_call_operand.vmem [shape: f32[1,128], index: 2, kind: input, shape index: {}]   ;;  %s77_s3 = inlined_call_operand.vmem [shape: f32[16,128], index: 3, kind: output, shape index: {}]  }
   0x1   :  { %v14_v0 = vld [vmem:[%s74_s0] sm:$0xff]  ;;  %v15_v3 = vld [vmem:[%s74_s0 + $0x8] sm:$0xff] }
   0x2   :  { %v34_v1 = vld [vmem:[%s75_s1] ss:$0 sm:$0xff] }
   0x3   :  { %v35_v2 = vld [vmem:[%s76_s2] ss:$0 sm:$0xff]  ;;  %v20_v4 = vmul.f32 %v34_v1, %v14_v0  ;;  %v21_v5 = vmul.f32 %v34_v1, %v15_v3 }
   0x5   :  { %v26_v6 = vadd.f32 %v35_v2, %v20_v4  ;;  %v27_v7 = vadd.f32 %v35_v2, %v21_v5 }
   0x7   :  { %28 = vst [vmem:[%s77_s3] sm:$0xff] %v26_v6 }
   0x8   :  { %29 = vst [vmem:[%s77_s3 + $0x8] sm:$0xff] %v27_v7 }

</bundles_post_ra>
